<compile_context>
chip_gen: v7x
topology: tpu7x:2x2x1
jax: 0.10.0
libtpu: 0.0.40
codegen_flags: <defaults>
</compile_context>

<pallas_src>
import math

import jax
import jax.numpy as jnp
from jax.experimental import pallas as pl
from jax.experimental.pallas import tpu as pltpu


LANE = 128


def _round_up(x, m):
    return ((x + m - 1) // m) * m


def _dqn_kernel(x_ref, w1_ref, w2_ref, w3_ref, bias_ref, out_ref):
    h = w2_ref.shape[0]            # hidden width (64)
    n_out = out_ref.shape[1]       # lane-padded output width (multiple of 128)

    b = bias_ref[...]              # (8, bias_w) f32; rows 0/1/2 hold b1/b2/b3
    x = x_ref[...]                 # (TB, D_in) in compute dtype (f32 or bf16)

    # Layer 1: MXU matmul with f32 accumulation, bias add + ReLU in f32.
    h1 = jnp.dot(x, w1_ref[...], preferred_element_type=jnp.float32)
    h1 = jnp.maximum(h1 + b[0:1, :h], 0.0)

    # Layer 2 (re-cast activations to the MXU input dtype; no-op for f32).
    h2 = jnp.dot(h1.astype(w2_ref.dtype), w2_ref[...],
                 preferred_element_type=jnp.float32)
    h2 = jnp.maximum(h2 + b[1:2, :h], 0.0)

    # Layer 3 -> lane-dense (TB, n_out) slab.
    y = jnp.dot(h2.astype(w3_ref.dtype), w3_ref[...],
                preferred_element_type=jnp.float32)
    out_ref[...] = (y + b[2:3, :n_out]).astype(out_ref.dtype)


def dqn_forward(state, params, *, batch_tile=None, compute_dtype=jnp.float32):
    """Forward pass of DQN.  state: (B, input_dim) float32 -> (B, output_dim) f32.

    compute_dtype: dtype fed to the MXU (jnp.float32 or jnp.bfloat16).
    Accumulation / bias / ReLU are always f32.
    """
    w1, b1, w2, b2, w3, b3 = (
        params["w1"], params["b1"], params["w2"],
        params["b2"], params["w3"], params["b3"],
    )
    B, d_in = state.shape
    h = w1.shape[1]
    d_out = w3.shape[1]

    # --- batch tiling: multiple of 8, capped at 256 rows; pad ragged batches ---
    if batch_tile is None:
        batch_tile = min(256, _round_up(B, 8))
    tb = batch_tile
    assert tb % 8 == 0, "batch_tile must be a multiple of 8 (sublane granule)"
    B_pad = _round_up(B, tb)
    if B_pad != B:
        state = jnp.pad(state, ((0, B_pad - B), (0, 0)))
    grid = (B_pad // tb,)

    # --- lane-dense output padding for W3 / b3 ---
    d_out_pad = _round_up(d_out, LANE)
    bias_w = max(_round_up(h, LANE), d_out_pad)

    x = state.astype(compute_dtype)
    w1c = w1.astype(compute_dtype)
    w2c = w2.astype(compute_dtype)
    w3p = jnp.zeros((h, d_out_pad), compute_dtype).at[:, :d_out].set(
        w3.astype(compute_dtype))

    # Pack all biases (f32) into one vreg-sized slab: rows 0/1/2 = b1/b2/b3.
    bias = jnp.zeros((8, bias_w), jnp.float32)
    bias = bias.at[0, :h].set(b1.reshape(-1).astype(jnp.float32))
    bias = bias.at[1, :h].set(b2.reshape(-1).astype(jnp.float32))
    bias = bias.at[2, :d_out].set(b3.reshape(-1).astype(jnp.float32))

    # Advisory cost estimate (keeps XLA from serializing this tiny kernel).
    itemsize = jnp.dtype(compute_dtype).itemsize
    flops = 2 * B_pad * (d_in * h + h * h + h * d_out_pad)
    bytes_accessed = (
        B_pad * d_in * itemsize                      # state in
        + (d_in * h + h * h + h * d_out_pad) * itemsize  # weights
        + 8 * bias_w * 4                             # bias slab
        + B_pad * d_out_pad * 4                      # output slab
    )

    out = pl.pallas_call(
        _dqn_kernel,
        out_shape=jax.ShapeDtypeStruct((B_pad, d_out_pad), jnp.float32),
        grid=grid,
        in_specs=[
            pl.BlockSpec((tb, d_in), lambda i: (i, 0)),        # state tile
            pl.BlockSpec((d_in, h), lambda i: (0, 0)),         # W1 (resident)
            pl.BlockSpec((h, h), lambda i: (0, 0)),            # W2 (resident)
            pl.BlockSpec((h, d_out_pad), lambda i: (0, 0)),    # W3 padded
            pl.BlockSpec((8, bias_w), lambda i: (0, 0)),       # packed biases
        ],
        out_specs=pl.BlockSpec((tb, d_out_pad), lambda i: (i, 0)),
        compiler_params=pltpu.CompilerParams(
            dimension_semantics=("parallel",)),
        cost_estimate=pl.CostEstimate(
            flops=flops, transcendentals=0, bytes_accessed=bytes_accessed),
    )(x, w1c, w2c, w3p, bias)

    return out[:B, :d_out]


def init_dqn_params(key, input_dim, output_dim, hidden=64):
    """PyTorch nn.Linear default init (U[-1/sqrt(fan_in), +1/sqrt(fan_in)]).
    Weights stored as (in_features, out_features)."""
    ks = jax.random.split(key, 6)

    def lin(kw, kb, fan_in, fan_out):
        bound = 1.0 / math.sqrt(fan_in)
        w = jax.random.uniform(kw, (fan_in, fan_out), jnp.float32, -bound, bound)
        b = jax.random.uniform(kb, (1, fan_out), jnp.float32, -bound, bound)
        return w, b

    w1, b1 = lin(ks[0], ks[1], input_dim, hidden)
    w2, b2 = lin(ks[2], ks[3], hidden, hidden)
    w3, b3 = lin(ks[4], ks[5], hidden, output_dim)
    return {"w1": w1, "b1": b1, "w2": w2, "b2": b2, "w3": w3, "b3": b3}


def dqn_reference(state, params):
    """Pure-JAX reference for correctness checking."""
    x = jnp.maximum(state @ params["w1"] + params["b1"], 0.0)
    x = jnp.maximum(x @ params["w2"] + params["b2"], 0.0)
    return x @ params["w3"] + params["b3"]


if __name__ == "__main__":
    key = jax.random.PRNGKey(0)
    k_param, k_state1, k_state2 = jax.random.split(key, 3)

    input_dim, output_dim = 16, 4
    params = init_dqn_params(k_param, input_dim, output_dim, hidden=64)

    # 1) Small batch (single tile), f32 path -- tight tolerance.
    state_small = jax.random.normal(k_state1, (8, input_dim), jnp.float32)
    out_small = jax.block_until_ready(dqn_forward(state_small, params))
    ref_small = dqn_reference(state_small, params)
    assert out_small.shape == (8, output_dim)
    assert jnp.allclose(out_small, ref_small, atol=1e-5, rtol=1e-5), \
        "f32 small-batch mismatch vs reference"

    # 2) Ragged larger batch (exercises 256-row tiles, grid=2 pipelining,
    #    zero-pad + slice, lane-dense output slab), f32 path.
    state_big = jax.random.normal(k_state2, (300, input_dim), jnp.float32)
    out_big = jax.block_until_ready(dqn_forward(state_big, params))
    ref_big = dqn_reference(state_big, params)
    assert out_big.shape == (300, output_dim)
    assert jnp.allclose(out_big, ref_big, atol=1e-5, rtol=1e-5), \
        "f32 tiled-batch mismatch vs reference"

    # 3) bf16 MXU-input path (f32 accumulation) -- looser tolerance.
    out_bf16 = jax.block_until_ready(
        dqn_forward(state_big, params, compute_dtype=jnp.bfloat16))
    assert out_bf16.shape == (300, output_dim)
    assert jnp.allclose(out_bf16, ref_big, atol=5e-2, rtol=5e-2), \
        "bf16 mismatch vs reference"

    print("KERNEL_OK")
</pallas_src>

<mosaic_0001>
module attributes {stable_mosaic.version = 11 : i64} {
  func.func @_dqn_kernel(%arg0: i32, %arg1: memref<8x16xf32, #tpu.memory_space<vmem>>, %arg2: memref<16x64xf32, #tpu.memory_space<vmem>>, %arg3: memref<64x64xf32, #tpu.memory_space<vmem>>, %arg4: memref<64x128xf32, #tpu.memory_space<vmem>>, %arg5: memref<8x128xf32, #tpu.memory_space<vmem>>, %arg6: memref<8x128xf32, #tpu.memory_space<vmem>>) attributes {dimension_semantics = [#tpu.dimension_semantics<parallel>], iteration_bounds = array<i64: 1>, scalar_prefetch = 0 : i64, scratch_operands = 0 : i64, tpu.core_type = #tpu.core_type<tc>, window_params = [{transform_indices = @transform_0, window_bounds = array<i64: 8, 16>}, {pipeline_mode = #tpu.pipeline_mode<synchronous>, transform_indices = @transform_1, window_bounds = array<i64: 16, 64>}, {pipeline_mode = #tpu.pipeline_mode<synchronous>, transform_indices = @transform_2, window_bounds = array<i64: 64, 64>}, {pipeline_mode = #tpu.pipeline_mode<synchronous>, transform_indices = @transform_3, window_bounds = array<i64: 64, 128>}, {pipeline_mode = #tpu.pipeline_mode<synchronous>, transform_indices = @transform_4, window_bounds = array<i64: 8, 128>}, {transform_indices = @transform_5, window_bounds = array<i64: 8, 128>}]} {
    %c0 = arith.constant 0 : index
    %c0_0 = arith.constant 0 : index
    %0 = vector.load %arg5[%c0, %c0_0] : memref<8x128xf32, #tpu.memory_space<vmem>>, vector<8x128xf32>
    %c0_1 = arith.constant 0 : index
    %c0_2 = arith.constant 0 : index
    %1 = vector.load %arg1[%c0_1, %c0_2] : memref<8x16xf32, #tpu.memory_space<vmem>>, vector<8x16xf32>
    %c0_3 = arith.constant 0 : index
    %c0_4 = arith.constant 0 : index
    %2 = vector.load %arg2[%c0_3, %c0_4] : memref<16x64xf32, #tpu.memory_space<vmem>>, vector<16x64xf32>
    %cst = arith.constant dense<0.000000e+00> : vector<8x64xf32>
    %3 = tpu.matmul %1, %2, %cst {dimension_numbers = #tpu.dot_dimension_numbers<[1], [0], [0], [1], [0, 0, 1, 1], [], []>} : vector<8x16xf32>, vector<16x64xf32>, vector<8x64xf32> -> vector<8x64xf32>
    %4 = vector.extract_strided_slice %0 {offsets = [0, 0], sizes = [1, 64], strides = [1, 1]} : vector<8x128xf32> to vector<1x64xf32>
    %5 = vector.broadcast %4 : vector<1x64xf32> to vector<8x64xf32>
    %6 = arith.addf %3, %5 : vector<8x64xf32>
    %cst_5 = arith.constant 0.000000e+00 : f32
    %7 = vector.broadcast %cst_5 : f32 to vector<8x64xf32>
    %8 = arith.maximumf %6, %7 : vector<8x64xf32>
    %c0_6 = arith.constant 0 : index
    %c0_7 = arith.constant 0 : index
    %9 = vector.load %arg3[%c0_6, %c0_7] : memref<64x64xf32, #tpu.memory_space<vmem>>, vector<64x64xf32>
    %cst_8 = arith.constant dense<0.000000e+00> : vector<8x64xf32>
    %10 = tpu.matmul %8, %9, %cst_8 {dimension_numbers = #tpu.dot_dimension_numbers<[1], [0], [0], [1], [0, 0, 1, 1], [], []>} : vector<8x64xf32>, vector<64x64xf32>, vector<8x64xf32> -> vector<8x64xf32>
    %11 = vector.extract_strided_slice %0 {offsets = [1, 0], sizes = [1, 64], strides = [1, 1]} : vector<8x128xf32> to vector<1x64xf32>
    %12 = vector.broadcast %11 : vector<1x64xf32> to vector<8x64xf32>
    %13 = arith.addf %10, %12 : vector<8x64xf32>
    %cst_9 = arith.constant 0.000000e+00 : f32
    %14 = vector.broadcast %cst_9 : f32 to vector<8x64xf32>
    %15 = arith.maximumf %13, %14 : vector<8x64xf32>
    %c0_10 = arith.constant 0 : index
    %c0_11 = arith.constant 0 : index
    %16 = vector.load %arg4[%c0_10, %c0_11] : memref<64x128xf32, #tpu.memory_space<vmem>>, vector<64x128xf32>
    %cst_12 = arith.constant dense<0.000000e+00> : vector<8x128xf32>
    %17 = tpu.matmul %15, %16, %cst_12 {dimension_numbers = #tpu.dot_dimension_numbers<[1], [0], [0], [1], [0, 0, 1, 1], [], []>} : vector<8x64xf32>, vector<64x128xf32>, vector<8x128xf32> -> vector<8x128xf32>
    %18 = vector.extract_strided_slice %0 {offsets = [2, 0], sizes = [1, 128], strides = [1, 1]} : vector<8x128xf32> to vector<1x128xf32>
    %19 = vector.broadcast %18 : vector<1x128xf32> to vector<8x128xf32>
    %20 = arith.addf %17, %19 : vector<8x128xf32>
    %c0_13 = arith.constant 0 : index
    %c0_14 = arith.constant 0 : index
    %21 = vector.load %arg6[%c0_13, %c0_14] : memref<8x128xf32, #tpu.memory_space<vmem>>, vector<8x128xf32>
    tpu.vector_store %arg6[%c0_13, %c0_14], %20 {strides = array<i32>} : memref<8x128xf32, #tpu.memory_space<vmem>>, vector<8x128xf32>,
    return
  }
  func.func @transform_0(%arg0: i32) -> (i32, i32) {
    %c0_i32 = arith.constant 0 : i32
    %c0_i32_0 = arith.constant 0 : i32
    return %arg0, %c0_i32 : i32, i32
  }
  func.func @transform_1(%arg0: i32) -> (i32, i32) {
    %c0_i32 = arith.constant 0 : i32
    %c0_i32_0 = arith.constant 0 : i32
    %c0_i32_1 = arith.constant 0 : i32
    return %c0_i32, %c0_i32_0 : i32, i32
  }
  func.func @transform_2(%arg0: i32) -> (i32, i32) {
    %c0_i32 = arith.constant 0 : i32
    %c0_i32_0 = arith.constant 0 : i32
    %c0_i32_1 = arith.constant 0 : i32
    return %c0_i32, %c0_i32_0 : i32, i32
  }
  func.func @transform_3(%arg0: i32) -> (i32, i32) {
    %c0_i32 = arith.constant 0 : i32
    %c0_i32_0 = arith.constant 0 : i32
    %c0_i32_1 = arith.constant 0 : i32
    return %c0_i32, %c0_i32_0 : i32, i32
  }
  func.func @transform_4(%arg0: i32) -> (i32, i32) {
    %c0_i32 = arith.constant 0 : i32
    %c0_i32_0 = arith.constant 0 : i32
    %c0_i32_1 = arith.constant 0 : i32
    return %c0_i32, %c0_i32_0 : i32, i32
  }
  func.func @transform_5(%arg0: i32) -> (i32, i32) {
    %c0_i32 = arith.constant 0 : i32
    %c0_i32_0 = arith.constant 0 : i32
    return %arg0, %c0_i32 : i32, i32
  }
}

</mosaic_0001>

<bundles_post_ra>
// kernel: tpu_custom_call.1
= control target key start
LH: loop header
LB: loop body
LE: loop exit
PB: predicated region body
PF: predicated region fallthrough
CT: control target
= control target key end

     0   :  { %10 = vsyncpa [#allocation3], 0  ;;  %s686_s0 = inlined_call_operand.hbm [shape: f32[8,16], index: 0, kind: input, shape index: {}]   ;;  %s687_s1 = inlined_call_operand.hbm [shape: f32[16,64], index: 1, kind: input, shape index: {}]   ;;  %s688_s2 = inlined_call_operand.hbm [shape: f32[64,64], index: 2, kind: input, shape index: {}]   ;;  %s689_s3 = inlined_call_operand.hbm [shape: f32[64,128], index: 3, kind: input, shape index: {}]   ;;  %s690_s4 = inlined_call_operand.vmem [shape: f32[8,128], index: 4, kind: input, shape index: {}]   ;;  %s691_s5 = inlined_call_operand.hbm [shape: f32[8,128], index: 5, kind: output, shape index: {}]  }
   0x1   :  { %11 = vsyncpa [#allocation6], 0 }
   0x2   :  { %12 = vsyncpa [#allocation9], 0 }
   0x3   :  { %13 = vsyncpa [#allocation4], 0  ;;  %s571_s18 = smov [#allocation5]   ;;  %s453_s22 = scalar_lea.hbm %s687_s1, 256 }
   0x4   :  { %s29_s19 = sshll.u32 %s571_s18, 4  ;;  %p454_p0 = scmp.ne.s32.totalorder %s687_s1, %s453_s22  ;;  %s30_s19 = int_to_ptr.vmem [resolvable:$true] %s29_s19 }
   0x5   :  { %p457_p1 = scmp.lt.u32.totalorder %s453_s22, %s687_s1 }
   0x7   :  { %p459_p2 = pnand %p457_p1, %p454_p0 }
   0x9   :  { %462 = shalt.err (!%p459_p2)
}
   0xa   :  { %s463_s27 = scalar_lea.vmem %s30_s19, 256  ;;  %p468_p4 = scmp.lt.s32.totalorder %s30_s19, %s30_s19 }
   0xb   :  { %p464_p3 = scmp.ne.s32.totalorder %s30_s19, %s463_s27  ;;  %p469_p5 = scmp.lt.s32.totalorder %s463_s27, %s463_s27 }
   0xd   :  { %p470_p6 = por %p469_p5, %p468_p4 }
   0xf   :  { %p471_p7 = pnand %p470_p6, %p464_p3 }
  0x11   :  { %474 = shalt.err (!%p471_p7)
}
  0x12   :  { %s572_s28 = smov 128   ;;  %s573_s29 = smov 8  }
  0x13   :  { %35 = dma.hbm_to_vmem [thread:$0]  %s687_s1, 256, %s30_s19, [#allocation6], %s572_s28, %s572_s28, %s573_s29  }
  0x14   :  { %s574_s7 = smov [#allocation2]   ;;  %s575_s9 = smov [#allocation7]  }
  0x15   :  { %s20_s8 = sshll.u32 %s574_s7, 4  ;;  %s41_s10 = sshll.u32 %s575_s9, 4  ;;  %s21_s8 = int_to_ptr.vmem [resolvable:$true] %s20_s8  ;;  %s42_s10 = int_to_ptr.vmem [resolvable:$true] %s41_s10 }
  0x16   :  { %s475_s13 = scalar_lea.hbm %s686_s0, 128 }
  0x17   :  { %p476_p8 = scmp.ne.s32.totalorder %s686_s0, %s475_s13  ;;  %p479_p9 = scmp.lt.u32.totalorder %s475_s13, %s686_s0 }
  0x19   :  { %p481_p10 = pnand %p479_p9, %p476_p8 }
  0x1b   :  { %484 = shalt.err (!%p481_p10)
}
  0x1c   :  { %s485_s1 = scalar_lea.vmem %s21_s8, 128  ;;  %p490_p12 = scmp.lt.s32.totalorder %s21_s8, %s21_s8 }
  0x1d   :  { %p486_p11 = scmp.ne.s32.totalorder %s21_s8, %s485_s1  ;;  %p491_p13 = scmp.lt.s32.totalorder %s485_s1, %s485_s1 }
  0x1f   :  { %p492_p0 = por %p491_p13, %p490_p12 }
  0x21   :  { %p493_p1 = pnand %p492_p0, %p486_p11 }
  0x23   :  { %496 = shalt.err (!%p493_p1)
}
  0x24   :  { %23 = dma.hbm_to_vmem [thread:$0]  %s686_s0, 128, %s21_s8, [#allocation3]  }
  0x25   :  { %s497_s22 = scalar_lea.hbm %s688_s2, 1024 }
  0x26   :  { %p498_p2 = scmp.ne.s32.totalorder %s688_s2, %s497_s22  ;;  %p501_p3 = scmp.lt.u32.totalorder %s497_s22, %s688_s2 }
  0x28   :  { %p503_p4 = pnand %p501_p3, %p498_p2 }
  0x2a   :  { %506 = shalt.err (!%p503_p4)
}
  0x2b   :  { %s507_s27 = scalar_lea.vmem %s42_s10, 1024  ;;  %p512_p6 = scmp.lt.s32.totalorder %s42_s10, %s42_s10 }
  0x2c   :  { %p508_p5 = scmp.ne.s32.totalorder %s42_s10, %s507_s27  ;;  %p513_p7 = scmp.lt.s32.totalorder %s507_s27, %s507_s27 }
  0x2e   :  { %p514_p8 = por %p513_p7, %p512_p6 }
  0x30   :  { %p515_p9 = pnand %p514_p8, %p508_p5 }
  0x32   :  { %518 = shalt.err (!%p515_p9)
}
  0x33   :  { %47 = dma.hbm_to_vmem [thread:$0]  %s688_s2, 1024, %s42_s10, [#allocation6], %s572_s28, %s572_s28, %s573_s29  }
  0x34   :  { %s576_s6 = smov [#allocation8]   ;;  %s519_s11 = scalar_lea.hbm %s689_s3, 1024 }
  0x35   :  { %s53_s7 = sshll.u32 %s576_s6, 4  ;;  %p520_p10 = scmp.ne.s32.totalorder %s689_s3, %s519_s11  ;;  %s54_s7 = int_to_ptr.vmem [resolvable:$true] %s53_s7 }
  0x36   :  { %p523_p11 = scmp.lt.u32.totalorder %s519_s11, %s689_s3 }
  0x38   :  { %p525_p12 = pnand %p523_p11, %p520_p10 }
  0x3a   :  { %528 = shalt.err (!%p525_p12)
}
  0x3b   :  { %s529_s16 = scalar_lea.vmem %s54_s7, 1024  ;;  %p534_p0 = scmp.lt.s32.totalorder %s54_s7, %s54_s7 }
  0x3c   :  { %p530_p13 = scmp.ne.s32.totalorder %s54_s7, %s529_s16  ;;  %p535_p1 = scmp.lt.s32.totalorder %s529_s16, %s529_s16 }
  0x3e   :  { %p536_p2 = por %p535_p1, %p534_p0 }
  0x40   :  { %p537_p3 = pnand %p536_p2, %p530_p13 }
  0x42   :  { %540 = shalt.err (!%p537_p3)
}
  0x43   :  { %59 = dma.hbm_to_vmem [thread:$0]  %s689_s3, 1024, %s54_s7, [#allocation9], %s572_s28, %s572_s28, %s573_s29  }
  0x44   :  { %563 = dma.done.wait [#allocation3], 128  }
  0x45   :  { %564 = vsyncadd [#allocation3], 4294967168 }
  0x46   :  { %565 = dma.done.wait [#allocation6], 1280  }
  0x47   :  { %566 = vsyncadd [#allocation6], 4294966016 }
  0x48   :  { %567 = dma.done.wait [#allocation9], 1024  }
  0x49   :  { %568 = vsyncadd [#allocation9], 4294966272  ;;  %v577_v0 = vmov 0.0|0.0   ;;  %vm578_vm0 = vmmov 0   ;;  %v579_v1 = vmov 0.0   ;;  %v76_v2 = vld [vmem:[#allocation5] sm:$0xff]  ;;  %v78_v27 = vlaneseq }
  0x4a   :  { %416 = vmatprep.subr.bf16.mxu0 %v577_v0  ;;  %375 = vmatprep.mubr.msk.f32.mxu0 %vm578_vm0, %v579_v1  ;;  %v77_v3 = vld [vmem:[#allocation5 + $0x8] sm:$0xff]  ;;  %v157_v5 = vld [vmem:[#allocation7] sm:$0xff]  ;;  %v158_v6 = vld [vmem:[#allocation7 + $0x8] sm:$0xff]  ;;  %vm82_vm1 = vcmask 130048   ;;  %vm169_vm2 = vcmask 523264  }
  0x4b   :  { %419 = vmatprep.subr.bf16.mxu1 %v577_v0  ;;  %394 = vmatprep.mubr.msk.f32.mxu1 %vm578_vm0, %v579_v1  ;;  %v417_v4 = vpack.c.bf16 %v77_v3, %v76_v2  ;;  %v159_v7 = vld [vmem:[#allocation7 + $0x10] sm:$0xff]  ;;  %v420_v8 = vpack.c.bf16 %v158_v6, %v157_v5  ;;  %v160_v9 = vld [vmem:[#allocation7 + $0x18] sm:$0xff]  ;;  %v75_v10 = vld [vmem:[#allocation2] sm:$0xff]  ;;  %v79_v28 = vshrl.u32 %v78_v27, 7 }
  0x4c   :  { %v423_v11 = vpack.c.bf16 %v160_v9, %v159_v7  ;;  %v161_v12 = vld [vmem:[#allocation7 + $0x20] sm:$0xff]  ;;  %v162_v13 = vld [vmem:[#allocation7 + $0x28] sm:$0xff]  ;;  %v163_v15 = vld [vmem:[#allocation7 + $0x30] sm:$0xff] }
  0x4d   :  { %418 = vmatpush3.bf16.msra.mxu0 %v417_v4  ;;  %421 = vmatpush3.bf16.msra.mxu1 %v420_v8  ;;  %v426_v14 = vpack.c.bf16 %v162_v13, %v161_v12  ;;  %v164_v16 = vld [vmem:[#allocation7 + $0x38] sm:$0xff]  ;;  %v244_v18 = vld [vmem:[#allocation8] sm:$0xff]  ;;  %v245_v19 = vld [vmem:[#allocation8 + $0x8] sm:$0xff]  ;;  %v80_v29 = vsub.s32 0, %v79_v28  ;;  %v167_v39 = vsub.s32 1, %v79_v28  ;;  %v254_v45 = vsub.s32 2, %v79_v28 }
  0x4e   :  { %431 = vmatprep.subr.bf16.mxu0 %v577_v0  ;;  %422 = vmatprep.subr.bf16.mxu1 %v577_v0  ;;  %v429_v17 = vpack.c.bf16 %v164_v16, %v163_v15  ;;  %v246_v20 = vld [vmem:[#allocation8 + $0x10] sm:$0xff]  ;;  %v432_v21 = vpack.c.bf16 %v245_v19, %v244_v18  ;;  %v247_v22 = vld [vmem:[#allocation8 + $0x18] sm:$0xff]  ;;  %v248_v24 = vld [vmem:[#allocation8 + $0x20] sm:$0xff] }
  0x4f   :  { %v435_v23 = vpack.c.bf16 %v247_v22, %v246_v20  ;;  %v249_v25 = vld [vmem:[#allocation8 + $0x28] sm:$0xff]  ;;  %v250_v36 = vld [vmem:[#allocation8 + $0x30] sm:$0xff]  ;;  %v251_v37 = vld [vmem:[#allocation8 + $0x38] sm:$0xff] }
  0x50   :  { %376 = vmatmul.mubr.msk.f32.vlgmr.msra.gmra.mrb[0].mxu0 %vm82_vm1, %v75_v10  ;;  %v438_v26 = vpack.c.bf16 %v249_v25, %v248_v24  ;;  %v74_v30 = vld [vmem:[%s690_s4] sm:$0xff]  ;;  %v441_v38 = vpack.c.bf16 %v251_v37, %v250_v36  ;;  %s580_s4 = smov [#allocation10]  }
  0x51   :  { %413 = vmatprep.mubr.msk.f32.mxu0 %vm578_vm0, %v579_v1  ;;  %424 = vmatpush3.bf16.msra.mxu1 %v423_v11  ;;  %v81_v31 = vrot.slane %v74_v30, %v80_v29  ;;  %v168_v40 = vrot.slane %v74_v30, %v167_v39  ;;  %v255_v46 = vrot.slane %v74_v30, %v254_v45  ;;  %s336_s29 = sshll.u32 %s580_s4, 4  ;;  %s337_s29 = int_to_ptr.vmem [resolvable:$true] %s336_s29 }
  0x52   :  { %425 = vmatprep.subr.bf16.mxu1 %v577_v0  ;;  %433 = vmatpush3.bf16.msra.mxu0 %v432_v21  ;;  %s541_s17 = scalar_lea.vmem %s337_s29, 128  ;;  %p546_p5 = scmp.lt.s32.totalorder %s337_s29, %s337_s29 }
  0x53   :  { %434 = vmatprep.subr.bf16.mxu0 %v577_v0  ;;  %p542_p4 = scmp.ne.s32.totalorder %s337_s29, %s541_s17  ;;  %p547_p6 = scmp.lt.s32.totalorder %s541_s17, %s541_s17 }
  0x55   :  { %427 = vmatpush3.bf16.msra.mxu1 %v426_v14  ;;  %p548_p7 = por %p547_p6, %p546_p5 }
  0x56   :  { %428 = vmatprep.subr.bf16.mxu1 %v577_v0  ;;  %436 = vmatpush3.bf16.msra.mxu0 %v435_v23 }
  0x57   :  { %437 = vmatprep.subr.bf16.mxu0 %v577_v0  ;;  %p549_p8 = pnand %p548_p7, %p542_p4 }
  0x59   :  { %430 = vmatpush3.bf16.msra.mxu1 %v429_v17 }
  0x5a   :  { %439 = vmatpush3.bf16.msra.mxu0 %v438_v26 }
  0x5b   :  { %440 = vmatprep.subr.bf16.mxu0 %v577_v0 }
  0x5e   :  { %442 = vmatpush3.bf16.msra.mxu0 %v441_v38 }
 0x123   :  { %v152_v32 = vpop.f32.mrb[0].mxu0 }
 0x124   :  { %v153_v33 = vadd.f32 %v152_v32, %v81_v31  ;;  %v377_v34 = vpop.f32.mrb[1].mxu0 }
 0x126   :  { %v156_v35 = vmax.f32 %v153_v33, 0.0 }
 0x128   :  { %395 = vmatmul.mubr.msk.f32.vlgmr.msra.gmra.mrb[0].mxu1 %vm169_vm2, %v156_v35 }
 0x1fb   :  { %v239_v41 = vpop.f32.mrb[0].mxu1 }
 0x1fc   :  { %v240_v42 = vadd.f32 %v239_v41, %v168_v40  ;;  %v396_v43 = vpop.f32.mrb[1].mxu1 }
 0x1fe   :  { %v243_v44 = vmax.f32 %v240_v42, 0.0 }
 0x200   :  { %414 = vmatmul.mubr.msk.f32.vlgmr.msra.gmra.mrb[2].mxu0 %vm169_vm2, %v243_v44 }
 0x2d3   :  { %v325_v47 = vpop.f32.mrb[2].mxu0 }
 0x2d4   :  { %v326_v48 = vadd.f32 %v325_v47, %v255_v46  ;;  %v415_v49 = vpop.f32.mrb[3].mxu0 }
 0x2d6   :  { %329 = vst [vmem:[#allocation10] sm:$0xff] %v326_v48 }
 0x2d7   :  { %552 = shalt.err (!%p549_p8)
}
 0x2d8   :  { %s553_s19 = scalar_lea.hbm %s691_s5, 128 }
 0x2d9   :  { %p554_p9 = scmp.ne.s32.totalorder %s691_s5, %s553_s19  ;;  %p557_p10 = scmp.lt.u32.totalorder %s553_s19, %s691_s5 }
 0x2db   :  { %p559_p11 = pnand %p557_p10, %p554_p9 }
 0x2dd   :  { %562 = shalt.err (!%p559_p11)
}
 0x2de   :  { %339 = dma.vmem_to_hbm [thread:$0]  %s337_s29, 128, %s691_s5, [#allocation4]  }
 0x2df   :  { %569 = dma.done.wait [#allocation4], 128  }
 0x2e0   :  { %570 = vsyncadd [#allocation4], 4294967168 }
 0x2e1   :  { %343 = vsyncpa [#allocation3], 1 }
 0x2e2   :  { %344 = vsyncpa [#allocation6], 1 }
 0x2e3   :  { %345 = vsyncpa [#allocation9], 1 }
 0x2e4   :  { %346 = vsyncpa [#allocation4], 1 }

</bundles_post_ra>
